<compile_context>
chip_gen: v6e
topology: v6e:2x2x1
jax: 0.10.0
libtpu: 0.0.40
codegen_flags: <defaults>
</compile_context>

<pallas_src>
import functools

import jax
import jax.numpy as jnp
from jax import lax
from jax.experimental import pallas as pl
from jax.experimental.pallas import tpu as pltpu

_EPS = 1e-5
_NEG_SLOPE = 0.1
# Tap order (row-major over the 3x3 window); the weight re-layout matches it.
_TAPS = tuple((dy, dx) for dy in (-1, 0, 1) for dx in (-1, 0, 1))


def _conv3x3_in_lrelu(x_wide, w_flat, tap_masks, *, H, W, Nb):
    """conv3x3(pad=1, no bias) + InstanceNorm2d + LeakyReLU(0.1), Nb samples.

    x_wide:    (Cin, Nb*H*W) f32, samples concatenated along the lane axis.
    w_flat:    (Cout, 9*Cin) f32, column order (ky*3+kx)*Cin + ci.
    tap_masks: 9 per-tap validity masks (or None for the centre tap).
    Returns a list of Nb (Cout, H*W) activations.
    """
    HW = H * W
    L = Nb * HW

    # im2col built fully in registers: nine rolled + masked copies of x_wide
    # stacked along sublanes.  The border masks zero exactly the lanes where
    # the roll wraps (across the image border or a sample boundary), which are
    # also the lanes where the conv's zero padding applies.
    patches = []
    for (dy, dx), mask in zip(_TAPS, tap_masks):
        off = dy * W + dx
        patch = x_wide if off == 0 else pltpu.roll(x_wide, (-off) % L, axis=1)
        if mask is not None:
            patch = jnp.where(mask, patch, 0.0)
        patches.append(patch)
    im2col = jnp.concatenate(patches, axis=0)          # (9*Cin, Nb*HW)

    # One MXU push per stage: (Cout, 9*Cin) @ (9*Cin, Nb*HW), lane-dense.
    y = jnp.dot(w_flat, im2col, preferred_element_type=jnp.float32)

    # InstanceNorm2d (affine=False, eps=1e-5) + LeakyReLU(0.1), per sample.
    # HW is a multiple of 128, so every per-sample slice is a clean vreg range.
    inv_hw = 1.0 / HW
    outs = []
    for n in range(Nb):
        yn = y[:, n * HW:(n + 1) * HW]
        mean = jnp.sum(yn, axis=1, keepdims=True) * inv_hw
        ex2 = jnp.sum(yn * yn, axis=1, keepdims=True) * inv_hw
        var = jnp.maximum(ex2 - mean * mean, 0.0)      # cancellation guard
        scale = lax.rsqrt(var + _EPS)
        bias = -mean * scale
        z = yn * scale + bias
        outs.append(jnp.where(z >= 0, z, _NEG_SLOPE * z))
    return outs


def _conv_block_kernel(hw_ref, x_ref, w1_ref, w2_ref, o_ref, *, H, W, Nb):
    """Fused ConvBlock for Nb batch samples.

    hw_ref: (2, Nb*H*W)      VMEM  int32 per-lane (h, w) coordinates
    x_ref:  (Nb, Cin, H*W)   VMEM
    w1_ref: (Cout, 9*Cin)    VMEM
    w2_ref: (Cout, 9*Cout)   VMEM
    o_ref:  (Nb, Cout, H*W)  VMEM
    """
    # --- border masks: built ONCE per invocation, reused by both stages ----
    hw_ids = hw_ref[...]
    h_idx = hw_ids[0:1, :]
    w_idx = hw_ids[1:2, :]
    h_ge1 = h_idx >= 1
    h_le = h_idx <= H - 2
    w_ge1 = w_idx >= 1
    w_le = w_idx <= W - 2
    tap_masks = []
    for dy, dx in _TAPS:
        conds = []
        if dy == -1:
            conds.append(h_ge1)
        elif dy == 1:
            conds.append(h_le)
        if dx == -1:
            conds.append(w_ge1)
        elif dx == 1:
            conds.append(w_le)
        m = None
        for c in conds:
            m = c if m is None else (m & c)
        tap_masks.append(m)

    # Fuse the Nb samples onto the lane axis (lane-aligned concat; HW%128==0).
    if Nb == 1:
        x_wide = x_ref[0]
    else:
        x_wide = jnp.concatenate([x_ref[n] for n in range(Nb)], axis=1)

    a1 = _conv3x3_in_lrelu(x_wide, w1_ref[...], tap_masks, H=H, W=W, Nb=Nb)
    # Dropout2d (inference mode) == identity.
    a1_wide = a1[0] if Nb == 1 else jnp.concatenate(a1, axis=1)
    a2 = _conv3x3_in_lrelu(a1_wide, w2_ref[...], tap_masks, H=H, W=W, Nb=Nb)

    for n in range(Nb):
        o_ref[n] = a2[n].astype(o_ref.dtype)


def _conv_block_pallas(x_flat, w1_flat, w2_flat, H, W):
    N, Cin, HW = x_flat.shape
    Cout = w1_flat.shape[0]

    # Grid policy: at most 2 grid steps.  Samples inside a step are fused into
    # one wide matmul (lane dim Nb*HW) to amortise per-step fixed cost and
    # MXU push/drain latency; keeping 2 steps for N >= 2 still feeds both
    # v7x TensorCores.
    n_steps = min(N, 2)
    Nb = pl.cdiv(N, n_steps)
    Npad = n_steps * Nb
    if Npad != N:
        pad = jnp.zeros((Npad - N, Cin, HW), x_flat.dtype)
        x_flat = jnp.concatenate([x_flat, pad], axis=0)
    L = Nb * HW

    # Per-lane (h, w) coordinates for the border masks (tiny; div/mod done
    # here so the kernel only does vector compares).
    p = jnp.arange(HW, dtype=jnp.int32)
    hw_ids = jnp.stack([p // W, p % W]).astype(jnp.int32)   # (2, HW)
    if Nb > 1:
        hw_ids = jnp.tile(hw_ids, (1, Nb))                  # (2, Nb*HW)

    kernel = functools.partial(_conv_block_kernel, H=H, W=W, Nb=Nb)

    cost = pl.CostEstimate(
        flops=2 * 9 * Npad * HW * (Cin * Cout + Cout * Cout),
        transcendentals=2 * Npad * Cout,
        bytes_accessed=4 * (Npad * Cin * HW + Npad * Cout * HW
                            + 9 * Cin * Cout + 9 * Cout * Cout + 2 * L),
    )

    out = pl.pallas_call(
        kernel,
        out_shape=jax.ShapeDtypeStruct((Npad, Cout, HW), x_flat.dtype),
        grid_spec=pltpu.PrefetchScalarGridSpec(
            num_scalar_prefetch=0,
            grid=(n_steps,),
            in_specs=[
                pl.BlockSpec((2, L), lambda s: (0, 0)),
                pl.BlockSpec((Nb, Cin, HW), lambda s: (s, 0, 0)),
                pl.BlockSpec((Cout, 9 * Cin), lambda s: (0, 0)),
                pl.BlockSpec((Cout, 9 * Cout), lambda s: (0, 0)),
            ],
            out_specs=pl.BlockSpec((Nb, Cout, HW), lambda s: (s, 0, 0)),
        ),
        compiler_params=pltpu.CompilerParams(
            # TODO(synk): on v7x, confirm with xprof that the batch axis really
            # splits across both TensorCores; if one TC sits idle, switch this
            # axis to pltpu.CORE_PARALLEL.
            dimension_semantics=("parallel",),
            vmem_limit_bytes=32 * 1024 * 1024,
        ),
        cost_estimate=cost,
    )(hw_ids, x_flat, w1_flat, w2_flat)
    return out[:N]


@jax.jit
def conv_block_forward(x_nchw, w1_hwio, w2_hwio):
    """ConvBlock forward.

    x_nchw:  (N, Cin, H, W)
    w1_hwio: (3, 3, Cin, Cout)   first  conv weight (HWIO)
    w2_hwio: (3, 3, Cout, Cout)  second conv weight (HWIO)
    returns: (N, Cout, H, W)
    """
    N, Cin, H, W = x_nchw.shape
    Cout = w1_hwio.shape[-1]
    # Contiguous reshape (free): spatial flattened so it lands on lanes.
    x_flat = x_nchw.reshape(N, Cin, H * W)
    # HWIO -> (Cout, ky, kx, Cin) -> (Cout, 9*Cin) to match the im2col rows.
    w1_flat = jnp.transpose(w1_hwio, (3, 0, 1, 2)).reshape(Cout, 9 * Cin)
    w2_flat = jnp.transpose(w2_hwio, (3, 0, 1, 2)).reshape(Cout, 9 * Cout)
    out_flat = _conv_block_pallas(x_flat, w1_flat, w2_flat, H, W)
    return out_flat.reshape(N, Cout, H, W)


def _reference(x_nchw, w1, w2):
    """Pure-JAX reference (lax.conv, full f32 precision) for correctness."""
    def block(x, w):
        w_oihw = jnp.transpose(w, (3, 2, 0, 1))
        y = lax.conv_general_dilated(
            x, w_oihw, window_strides=(1, 1), padding=((1, 1), (1, 1)),
            dimension_numbers=("NCHW", "OIHW", "NCHW"),
            precision=lax.Precision.HIGHEST)
        mean = jnp.mean(y, axis=(2, 3), keepdims=True)
        var = jnp.mean((y - mean) ** 2, axis=(2, 3), keepdims=True)
        y = (y - mean) * lax.rsqrt(var + _EPS)
        return jnp.where(y >= 0, y, _NEG_SLOPE * y)
    return block(block(x_nchw, w1), w2)


if __name__ == "__main__":
    # Small shapes consistent with the module: N=2, in_chans=4, out_chans=8, 16x16.
    N, Cin, Cout, H, W = 2, 4, 8, 16, 16
    drop_prob = 0.0  # eval-mode Dropout2d == identity

    key = jax.random.PRNGKey(0)
    kx, k1, k2 = jax.random.split(key, 3)
    x = jax.random.normal(kx, (N, Cin, H, W), dtype=jnp.float32)
    # Deterministic "kaiming-ish" weights, HWIO layout.
    w1 = jax.random.normal(k1, (3, 3, Cin, Cout), dtype=jnp.float32) * (
        1.0 / jnp.sqrt(9.0 * Cin))
    w2 = jax.random.normal(k2, (3, 3, Cout, Cout), dtype=jnp.float32) * (
        1.0 / jnp.sqrt(9.0 * Cout))

    out = conv_block_forward(x, w1, w2)
    out = jax.block_until_ready(out)

    ref = _reference(x, w1, w2)
    assert out.shape == (N, Cout, H, W), out.shape
    err = float(jnp.max(jnp.abs(out - ref)))
    # Tolerance leaves headroom for MXU bf16-pass rounding of the f32 matmul;
    # any structural bug (roll direction, masks, weight layout) would be O(1).
    assert err < 1e-2, f"max abs err {err}"

    print("KERNEL_OK")
</pallas_src>

<mosaic_0001>
module attributes {stable_mosaic.version = 11 : i64} {
  func.func @_conv_block_kernel(%arg0: i32, %arg1: memref<2x256xi32, #tpu.memory_space<vmem>>, %arg2: memref<1x4x256xf32, #tpu.memory_space<vmem>>, %arg3: memref<8x36xf32, #tpu.memory_space<vmem>>, %arg4: memref<8x72xf32, #tpu.memory_space<vmem>>, %arg5: memref<1x8x256xf32, #tpu.memory_space<vmem>>) attributes {dimension_semantics = [#tpu.dimension_semantics<parallel>], iteration_bounds = array<i64: 2>, scalar_prefetch = 0 : i64, scratch_operands = 0 : i64, tpu.core_type = #tpu.core_type<tc>, window_params = [{pipeline_mode = #tpu.pipeline_mode<synchronous>, transform_indices = @transform_0, window_bounds = array<i64: 2, 256>}, {transform_indices = @transform_1, window_bounds = array<i64: 1, 4, 256>}, {pipeline_mode = #tpu.pipeline_mode<synchronous>, transform_indices = @transform_2, window_bounds = array<i64: 8, 36>}, {pipeline_mode = #tpu.pipeline_mode<synchronous>, transform_indices = @transform_3, window_bounds = array<i64: 8, 72>}, {transform_indices = @transform_4, window_bounds = array<i64: 1, 8, 256>}]} {
    %c0 = arith.constant 0 : index
    %c0_0 = arith.constant 0 : index
    %0 = vector.load %arg1[%c0, %c0_0] : memref<2x256xi32, #tpu.memory_space<vmem>>, vector<2x256xi32>
    %1 = vector.extract_strided_slice %0 {offsets = [0, 0], sizes = [1, 256], strides = [1, 1]} : vector<2x256xi32> to vector<1x256xi32>
    %2 = vector.extract_strided_slice %0 {offsets = [1, 0], sizes = [1, 256], strides = [1, 1]} : vector<2x256xi32> to vector<1x256xi32>
    %c1_i32 = arith.constant 1 : i32
    %3 = vector.broadcast %c1_i32 : i32 to vector<1x256xi32>
    %4 = arith.cmpi sge, %1, %3 : vector<1x256xi32>
    %c14_i32 = arith.constant 14 : i32
    %5 = vector.broadcast %c14_i32 : i32 to vector<1x256xi32>
    %6 = arith.cmpi sle, %1, %5 : vector<1x256xi32>
    %c1_i32_1 = arith.constant 1 : i32
    %7 = vector.broadcast %c1_i32_1 : i32 to vector<1x256xi32>
    %8 = arith.cmpi sge, %2, %7 : vector<1x256xi32>
    %c14_i32_2 = arith.constant 14 : i32
    %9 = vector.broadcast %c14_i32_2 : i32 to vector<1x256xi32>
    %10 = arith.cmpi sle, %2, %9 : vector<1x256xi32>
    %11 = arith.andi %4, %8 : vector<1x256xi1>
    %12 = arith.andi %4, %10 : vector<1x256xi1>
    %13 = arith.andi %6, %8 : vector<1x256xi1>
    %14 = arith.andi %6, %10 : vector<1x256xi1>
    %c0_3 = arith.constant 0 : index
    %c0_4 = arith.constant 0 : index
    %c0_5 = arith.constant 0 : index
    %15 = vector.load %arg2[%c0_3, %c0_4, %c0_5] : memref<1x4x256xf32, #tpu.memory_space<vmem>>, vector<1x4x256xf32>
    %16 = vector.shape_cast %15 : vector<1x4x256xf32> to vector<4x256xf32>
    %c0_6 = arith.constant 0 : index
    %c0_7 = arith.constant 0 : index
    %17 = vector.load %arg3[%c0_6, %c0_7] : memref<8x36xf32, #tpu.memory_space<vmem>>, vector<8x36xf32>
    %c17_i32 = arith.constant 17 : i32
    %18 = tpu.dynamic_rotate %16 by %c17_i32 dim 1 : vector<4x256xf32>, i32 -> vector<4x256xf32>
    %cst = arith.constant 0.000000e+00 : f32
    %19 = vector.shape_cast %11 : vector<1x256xi1> to vector<1x256xi1>
    %20 = vector.broadcast %19 : vector<1x256xi1> to vector<4x256xi1>
    %21 = vector.broadcast %cst : f32 to vector<4x256xf32>
    %22 = arith.select %20, %18, %21 : vector<4x256xi1>, vector<4x256xf32>
    %c16_i32 = arith.constant 16 : i32
    %23 = tpu.dynamic_rotate %16 by %c16_i32 dim 1 : vector<4x256xf32>, i32 -> vector<4x256xf32>
    %cst_8 = arith.constant 0.000000e+00 : f32
    %24 = vector.shape_cast %4 : vector<1x256xi1> to vector<1x256xi1>
    %25 = vector.broadcast %24 : vector<1x256xi1> to vector<4x256xi1>
    %26 = vector.broadcast %cst_8 : f32 to vector<4x256xf32>
    %27 = arith.select %25, %23, %26 : vector<4x256xi1>, vector<4x256xf32>
    %c15_i32 = arith.constant 15 : i32
    %28 = tpu.dynamic_rotate %16 by %c15_i32 dim 1 : vector<4x256xf32>, i32 -> vector<4x256xf32>
    %cst_9 = arith.constant 0.000000e+00 : f32
    %29 = vector.shape_cast %12 : vector<1x256xi1> to vector<1x256xi1>
    %30 = vector.broadcast %29 : vector<1x256xi1> to vector<4x256xi1>
    %31 = vector.broadcast %cst_9 : f32 to vector<4x256xf32>
    %32 = arith.select %30, %28, %31 : vector<4x256xi1>, vector<4x256xf32>
    %c1_i32_10 = arith.constant 1 : i32
    %33 = tpu.dynamic_rotate %16 by %c1_i32_10 dim 1 : vector<4x256xf32>, i32 -> vector<4x256xf32>
    %cst_11 = arith.constant 0.000000e+00 : f32
    %34 = vector.shape_cast %8 : vector<1x256xi1> to vector<1x256xi1>
    %35 = vector.broadcast %34 : vector<1x256xi1> to vector<4x256xi1>
    %36 = vector.broadcast %cst_11 : f32 to vector<4x256xf32>
    %37 = arith.select %35, %33, %36 : vector<4x256xi1>, vector<4x256xf32>
    %c255_i32 = arith.constant 255 : i32
    %38 = tpu.dynamic_rotate %16 by %c255_i32 dim 1 : vector<4x256xf32>, i32 -> vector<4x256xf32>
    %cst_12 = arith.constant 0.000000e+00 : f32
    %39 = vector.shape_cast %10 : vector<1x256xi1> to vector<1x256xi1>
    %40 = vector.broadcast %39 : vector<1x256xi1> to vector<4x256xi1>
    %41 = vector.broadcast %cst_12 : f32 to vector<4x256xf32>
    %42 = arith.select %40, %38, %41 : vector<4x256xi1>, vector<4x256xf32>
    %c241_i32 = arith.constant 241 : i32
    %43 = tpu.dynamic_rotate %16 by %c241_i32 dim 1 : vector<4x256xf32>, i32 -> vector<4x256xf32>
    %cst_13 = arith.constant 0.000000e+00 : f32
    %44 = vector.shape_cast %13 : vector<1x256xi1> to vector<1x256xi1>
    %45 = vector.broadcast %44 : vector<1x256xi1> to vector<4x256xi1>
    %46 = vector.broadcast %cst_13 : f32 to vector<4x256xf32>
    %47 = arith.select %45, %43, %46 : vector<4x256xi1>, vector<4x256xf32>
    %c240_i32 = arith.constant 240 : i32
    %48 = tpu.dynamic_rotate %16 by %c240_i32 dim 1 : vector<4x256xf32>, i32 -> vector<4x256xf32>
    %cst_14 = arith.constant 0.000000e+00 : f32
    %49 = vector.shape_cast %6 : vector<1x256xi1> to vector<1x256xi1>
    %50 = vector.broadcast %49 : vector<1x256xi1> to vector<4x256xi1>
    %51 = vector.broadcast %cst_14 : f32 to vector<4x256xf32>
    %52 = arith.select %50, %48, %51 : vector<4x256xi1>, vector<4x256xf32>
    %c239_i32 = arith.constant 239 : i32
    %53 = tpu.dynamic_rotate %16 by %c239_i32 dim 1 : vector<4x256xf32>, i32 -> vector<4x256xf32>
    %cst_15 = arith.constant 0.000000e+00 : f32
    %54 = vector.shape_cast %14 : vector<1x256xi1> to vector<1x256xi1>
    %55 = vector.broadcast %54 : vector<1x256xi1> to vector<4x256xi1>
    %56 = vector.broadcast %cst_15 : f32 to vector<4x256xf32>
    %57 = arith.select %55, %53, %56 : vector<4x256xi1>, vector<4x256xf32>
    %58 = tpu.concatenate %22, %27, %32, %37, %16, %42, %47, %52, %57 in 0 : vector<4x256xf32>, vector<4x256xf32>, vector<4x256xf32>, vector<4x256xf32>, vector<4x256xf32>, vector<4x256xf32>, vector<4x256xf32>, vector<4x256xf32>, vector<4x256xf32> -> vector<36x256xf32>
    %cst_16 = arith.constant dense<0.000000e+00> : vector<8x256xf32>
    %59 = tpu.matmul %17, %58, %cst_16 {dimension_numbers = #tpu.dot_dimension_numbers<[1], [0], [0], [1], [0, 0, 1, 1], [], []>} : vector<8x36xf32>, vector<36x256xf32>, vector<8x256xf32> -> vector<8x256xf32>
    %cst_17 = arith.constant dense<0.000000e+00> : vector<8xf32>
    %60 = vector.multi_reduction <add>, %59, %cst_17 [1] : vector<8x256xf32> to vector<8xf32>
    %61 = vector.shape_cast %60 : vector<8xf32> to vector<8x1xf32>
    %cst_18 = arith.constant 3.906250e-03 : f32
    %62 = vector.broadcast %cst_18 : f32 to vector<8x1xf32>
    %63 = arith.mulf %61, %62 : vector<8x1xf32>
    %64 = arith.mulf %59, %59 : vector<8x256xf32>
    %cst_19 = arith.constant dense<0.000000e+00> : vector<8xf32>
    %65 = vector.multi_reduction <add>, %64, %cst_19 [1] : vector<8x256xf32> to vector<8xf32>
    %66 = vector.shape_cast %65 : vector<8xf32> to vector<8x1xf32>
    %cst_20 = arith.constant 3.906250e-03 : f32
    %67 = vector.broadcast %cst_20 : f32 to vector<8x1xf32>
    %68 = arith.mulf %66, %67 : vector<8x1xf32>
    %69 = arith.mulf %63, %63 : vector<8x1xf32>
    %70 = arith.subf %68, %69 : vector<8x1xf32>
    %cst_21 = arith.constant 0.000000e+00 : f32
    %71 = vector.broadcast %cst_21 : f32 to vector<8x1xf32>
    %72 = arith.maximumf %70, %71 : vector<8x1xf32>
    %cst_22 = arith.constant 9.99999974E-6 : f32
    %73 = vector.broadcast %cst_22 : f32 to vector<8x1xf32>
    %74 = arith.addf %72, %73 : vector<8x1xf32>
    %75 = math.rsqrt %74 : vector<8x1xf32>
    %cst_23 = arith.constant 0.000000e+00 : f32
    %76 = vector.broadcast %cst_23 : f32 to vector<8x1xf32>
    %77 = arith.subf %76, %63 : vector<8x1xf32>
    %78 = arith.mulf %77, %75 : vector<8x1xf32>
    %79 = vector.broadcast %75 : vector<8x1xf32> to vector<8x256xf32>
    %80 = arith.mulf %59, %79 : vector<8x256xf32>
    %81 = vector.broadcast %78 : vector<8x1xf32> to vector<8x256xf32>
    %82 = arith.addf %80, %81 : vector<8x256xf32>
    %cst_24 = arith.constant 0.000000e+00 : f32
    %83 = vector.broadcast %cst_24 : f32 to vector<8x256xf32>
    %84 = arith.cmpf oge, %82, %83 : vector<8x256xf32>
    %cst_25 = arith.constant 1.000000e-01 : f32
    %85 = vector.broadcast %cst_25 : f32 to vector<8x256xf32>
    %86 = arith.mulf %85, %82 : vector<8x256xf32>
    %87 = arith.select %84, %82, %86 : vector<8x256xi1>, vector<8x256xf32>
    %c0_26 = arith.constant 0 : index
    %c0_27 = arith.constant 0 : index
    %88 = vector.load %arg4[%c0_26, %c0_27] : memref<8x72xf32, #tpu.memory_space<vmem>>, vector<8x72xf32>
    %c17_i32_28 = arith.constant 17 : i32
    %89 = tpu.dynamic_rotate %87 by %c17_i32_28 dim 1 : vector<8x256xf32>, i32 -> vector<8x256xf32>
    %cst_29 = arith.constant 0.000000e+00 : f32
    %90 = vector.shape_cast %11 : vector<1x256xi1> to vector<1x256xi1>
    %91 = vector.broadcast %90 : vector<1x256xi1> to vector<8x256xi1>
    %92 = vector.broadcast %cst_29 : f32 to vector<8x256xf32>
    %93 = arith.select %91, %89, %92 : vector<8x256xi1>, vector<8x256xf32>
    %c16_i32_30 = arith.constant 16 : i32
    %94 = tpu.dynamic_rotate %87 by %c16_i32_30 dim 1 : vector<8x256xf32>, i32 -> vector<8x256xf32>
    %cst_31 = arith.constant 0.000000e+00 : f32
    %95 = vector.shape_cast %4 : vector<1x256xi1> to vector<1x256xi1>
    %96 = vector.broadcast %95 : vector<1x256xi1> to vector<8x256xi1>
    %97 = vector.broadcast %cst_31 : f32 to vector<8x256xf32>
    %98 = arith.select %96, %94, %97 : vector<8x256xi1>, vector<8x256xf32>
    %c15_i32_32 = arith.constant 15 : i32
    %99 = tpu.dynamic_rotate %87 by %c15_i32_32 dim 1 : vector<8x256xf32>, i32 -> vector<8x256xf32>
    %cst_33 = arith.constant 0.000000e+00 : f32
    %100 = vector.shape_cast %12 : vector<1x256xi1> to vector<1x256xi1>
    %101 = vector.broadcast %100 : vector<1x256xi1> to vector<8x256xi1>
    %102 = vector.broadcast %cst_33 : f32 to vector<8x256xf32>
    %103 = arith.select %101, %99, %102 : vector<8x256xi1>, vector<8x256xf32>
    %c1_i32_34 = arith.constant 1 : i32
    %104 = tpu.dynamic_rotate %87 by %c1_i32_34 dim 1 : vector<8x256xf32>, i32 -> vector<8x256xf32>
    %cst_35 = arith.constant 0.000000e+00 : f32
    %105 = vector.shape_cast %8 : vector<1x256xi1> to vector<1x256xi1>
    %106 = vector.broadcast %105 : vector<1x256xi1> to vector<8x256xi1>
    %107 = vector.broadcast %cst_35 : f32 to vector<8x256xf32>
    %108 = arith.select %106, %104, %107 : vector<8x256xi1>, vector<8x256xf32>
    %c255_i32_36 = arith.constant 255 : i32
    %109 = tpu.dynamic_rotate %87 by %c255_i32_36 dim 1 : vector<8x256xf32>, i32 -> vector<8x256xf32>
    %cst_37 = arith.constant 0.000000e+00 : f32
    %110 = vector.shape_cast %10 : vector<1x256xi1> to vector<1x256xi1>
    %111 = vector.broadcast %110 : vector<1x256xi1> to vector<8x256xi1>
    %112 = vector.broadcast %cst_37 : f32 to vector<8x256xf32>
    %113 = arith.select %111, %109, %112 : vector<8x256xi1>, vector<8x256xf32>
    %c241_i32_38 = arith.constant 241 : i32
    %114 = tpu.dynamic_rotate %87 by %c241_i32_38 dim 1 : vector<8x256xf32>, i32 -> vector<8x256xf32>
    %cst_39 = arith.constant 0.000000e+00 : f32
    %115 = vector.shape_cast %13 : vector<1x256xi1> to vector<1x256xi1>
    %116 = vector.broadcast %115 : vector<1x256xi1> to vector<8x256xi1>
    %117 = vector.broadcast %cst_39 : f32 to vector<8x256xf32>
    %118 = arith.select %116, %114, %117 : vector<8x256xi1>, vector<8x256xf32>
    %c240_i32_40 = arith.constant 240 : i32
    %119 = tpu.dynamic_rotate %87 by %c240_i32_40 dim 1 : vector<8x256xf32>, i32 -> vector<8x256xf32>
    %cst_41 = arith.constant 0.000000e+00 : f32
    %120 = vector.shape_cast %6 : vector<1x256xi1> to vector<1x256xi1>
    %121 = vector.broadcast %120 : vector<1x256xi1> to vector<8x256xi1>
    %122 = vector.broadcast %cst_41 : f32 to vector<8x256xf32>
    %123 = arith.select %121, %119, %122 : vector<8x256xi1>, vector<8x256xf32>
    %c239_i32_42 = arith.constant 239 : i32
    %124 = tpu.dynamic_rotate %87 by %c239_i32_42 dim 1 : vector<8x256xf32>, i32 -> vector<8x256xf32>
    %cst_43 = arith.constant 0.000000e+00 : f32
    %125 = vector.shape_cast %14 : vector<1x256xi1> to vector<1x256xi1>
    %126 = vector.broadcast %125 : vector<1x256xi1> to vector<8x256xi1>
    %127 = vector.broadcast %cst_43 : f32 to vector<8x256xf32>
    %128 = arith.select %126, %124, %127 : vector<8x256xi1>, vector<8x256xf32>
    %129 = tpu.concatenate %93, %98, %103, %108, %87, %113, %118, %123, %128 in 0 : vector<8x256xf32>, vector<8x256xf32>, vector<8x256xf32>, vector<8x256xf32>, vector<8x256xf32>, vector<8x256xf32>, vector<8x256xf32>, vector<8x256xf32>, vector<8x256xf32> -> vector<72x256xf32>
    %cst_44 = arith.constant dense<0.000000e+00> : vector<8x256xf32>
    %130 = tpu.matmul %88, %129, %cst_44 {dimension_numbers = #tpu.dot_dimension_numbers<[1], [0], [0], [1], [0, 0, 1, 1], [], []>} : vector<8x72xf32>, vector<72x256xf32>, vector<8x256xf32> -> vector<8x256xf32>
    %cst_45 = arith.constant dense<0.000000e+00> : vector<8xf32>
    %131 = vector.multi_reduction <add>, %130, %cst_45 [1] : vector<8x256xf32> to vector<8xf32>
    %132 = vector.shape_cast %131 : vector<8xf32> to vector<8x1xf32>
    %cst_46 = arith.constant 3.906250e-03 : f32
    %133 = vector.broadcast %cst_46 : f32 to vector<8x1xf32>
    %134 = arith.mulf %132, %133 : vector<8x1xf32>
    %135 = arith.mulf %130, %130 : vector<8x256xf32>
    %cst_47 = arith.constant dense<0.000000e+00> : vector<8xf32>
    %136 = vector.multi_reduction <add>, %135, %cst_47 [1] : vector<8x256xf32> to vector<8xf32>
    %137 = vector.shape_cast %136 : vector<8xf32> to vector<8x1xf32>
    %cst_48 = arith.constant 3.906250e-03 : f32
    %138 = vector.broadcast %cst_48 : f32 to vector<8x1xf32>
    %139 = arith.mulf %137, %138 : vector<8x1xf32>
    %140 = arith.mulf %134, %134 : vector<8x1xf32>
    %141 = arith.subf %139, %140 : vector<8x1xf32>
    %cst_49 = arith.constant 0.000000e+00 : f32
    %142 = vector.broadcast %cst_49 : f32 to vector<8x1xf32>
    %143 = arith.maximumf %141, %142 : vector<8x1xf32>
    %cst_50 = arith.constant 9.99999974E-6 : f32
    %144 = vector.broadcast %cst_50 : f32 to vector<8x1xf32>
    %145 = arith.addf %143, %144 : vector<8x1xf32>
    %146 = math.rsqrt %145 : vector<8x1xf32>
    %cst_51 = arith.constant 0.000000e+00 : f32
    %147 = vector.broadcast %cst_51 : f32 to vector<8x1xf32>
    %148 = arith.subf %147, %134 : vector<8x1xf32>
    %149 = arith.mulf %148, %146 : vector<8x1xf32>
    %150 = vector.broadcast %146 : vector<8x1xf32> to vector<8x256xf32>
    %151 = arith.mulf %130, %150 : vector<8x256xf32>
    %152 = vector.broadcast %149 : vector<8x1xf32> to vector<8x256xf32>
    %153 = arith.addf %151, %152 : vector<8x256xf32>
    %cst_52 = arith.constant 0.000000e+00 : f32
    %154 = vector.broadcast %cst_52 : f32 to vector<8x256xf32>
    %155 = arith.cmpf oge, %153, %154 : vector<8x256xf32>
    %cst_53 = arith.constant 1.000000e-01 : f32
    %156 = vector.broadcast %cst_53 : f32 to vector<8x256xf32>
    %157 = arith.mulf %156, %153 : vector<8x256xf32>
    %158 = arith.select %155, %153, %157 : vector<8x256xi1>, vector<8x256xf32>
    %c0_54 = arith.constant 0 : index
    %c0_55 = arith.constant 0 : index
    %c0_56 = arith.constant 0 : index
    %159 = vector.load %arg5[%c0_54, %c0_55, %c0_56] : memref<1x8x256xf32, #tpu.memory_space<vmem>>, vector<1x8x256xf32>
    %160 = vector.shape_cast %159 : vector<1x8x256xf32> to vector<8x256xf32>
    %161 = vector.shape_cast %158 : vector<8x256xf32> to vector<1x8x256xf32>
    tpu.vector_store %arg5[%c0_54, %c0_55, %c0_56], %161 {strides = array<i32>} : memref<1x8x256xf32, #tpu.memory_space<vmem>>, vector<1x8x256xf32>,
    return
  }
  func.func @transform_0(%arg0: i32) -> (i32, i32) {
    %c0_i32 = arith.constant 0 : i32
    %c0_i32_0 = arith.constant 0 : i32
    %c0_i32_1 = arith.constant 0 : i32
    return %c0_i32, %c0_i32_0 : i32, i32
  }
  func.func @transform_1(%arg0: i32) -> (i32, i32, i32) {
    %c0_i32 = arith.constant 0 : i32
    %c0_i32_0 = arith.constant 0 : i32
    %c0_i32_1 = arith.constant 0 : i32
    return %arg0, %c0_i32, %c0_i32_0 : i32, i32, i32
  }
  func.func @transform_2(%arg0: i32) -> (i32, i32) {
    %c0_i32 = arith.constant 0 : i32
    %c0_i32_0 = arith.constant 0 : i32
    %c0_i32_1 = arith.constant 0 : i32
    return %c0_i32, %c0_i32_0 : i32, i32
  }
  func.func @transform_3(%arg0: i32) -> (i32, i32) {
    %c0_i32 = arith.constant 0 : i32
    %c0_i32_0 = arith.constant 0 : i32
    %c0_i32_1 = arith.constant 0 : i32
    return %c0_i32, %c0_i32_0 : i32, i32
  }
  func.func @transform_4(%arg0: i32) -> (i32, i32, i32) {
    %c0_i32 = arith.constant 0 : i32
    %c0_i32_0 = arith.constant 0 : i32
    %c0_i32_1 = arith.constant 0 : i32
    return %arg0, %c0_i32, %c0_i32_0 : i32, i32, i32
  }
}

</mosaic_0001>

<bundles_post_ra>
// kernel: conv_block_forward.1
= control target key start
LH: loop header
LB: loop body
LE: loop exit
PB: predicated region body
PF: predicated region fallthrough
CT: control target
= control target key end

     0   :  { %s906_s15 = smov 0   ;;  %s1277_s0 = inlined_call_operand.vmem [shape: s32[2,256], index: 0, kind: input, shape index: {}]   ;;  %s1278_s1 = inlined_call_operand.vmem [shape: f32[2,4,256], index: 1, kind: input, shape index: {}]   ;;  %s1279_s2 = inlined_call_operand.vmem [shape: f32[8,36], index: 2, kind: input, shape index: {}]   ;;  %s1280_s3 = inlined_call_operand.vmem [shape: f32[8,72], index: 3, kind: input, shape index: {}]   ;;  %s1281_s4 = inlined_call_operand.vmem [shape: f32[2,8,256], index: 4, kind: output, shape index: {}]  }
   0x1 LB: > { %s805_s16 = sadd.s32 4294967295, %s869_s15   ;;  %p809_p0 = scmp.ge.s32.totalorder %s869_s15, 1  ;;  %s869_s15 = sphi %s906_s15, %s14_s15  }
   0x2   : > { %p162_p1 = scmp.lt.s32.totalorder %s869_s15, 3 }
   0x4   : > { %p163_p2 = pnand %p809_p0, %p162_p1 }
   0x5   : > { %p188_p3 = scmp.lt.s32.totalorder (!%p163_p2), %s805_s16, 1  ;;  %s871_s21 = smov (!%p163_p2), 111  }
   0x6   : > { %166 = sbr.rel (%p163_p2) target bundleno = 1042 (0x412), region = 36  ;;  %s872_s22 = smov (!%p163_p2), 112  }
   0x7   : > { %s873_s23 = smov (!%p163_p2), 127   ;;  %s874_s24 = smov (!%p163_p2), 113  }
   0x8   : > { %s875_s25 = smov (!%p163_p2), 1   ;;  %s877_s26 = smov (!%p163_p2), 16  }
   0x9   : > { %s878_s27 = smov (!%p163_p2), 15   ;;  %s879_s28 = smov (!%p163_p2), 17  }
   0xb   : > { %s1317_s16 = smov (!%p188_p3, %s805_s16), 1  ;;  %v876_v2 = vmov 0.0   ;;  %v961_v3 = vld [vmem:[%s1277_s0] sm:$0xf]  ;;  %v880_v4 = vmov 0   ;;  %v222_v7 = vlaneseq  ;;  %vm464_vm9 = vcmask 1043456  }
   0xc   : > { %s838_s17 = sshll.u32 %s1317_s16, 3  ;;  %547 = vmatprep.mubr.f32.mxu0 %v876_v2  ;;  %714 = vmatprep.mubr.f32.mxu1 %v876_v2  ;;  %vm200_vm0 = vcmp.le.s32.totalorder %v961_v3, 14  ;;  %vm199_vm1 = vcmp.ge.s32.totalorder %v961_v3, 1  ;;  %s839_s9 = sshll.u32 %s1317_s16, 4 }
   0xd   : > { %s192_s20 = scalar_lea.vmem %s1278_s1, %s838_s17  ;;  %v206_v5 = vsel %vm200_vm0, 1, %v880_v4  ;;  %v975_v9 = vsel %vm199_vm1, 1, %v880_v4  ;;  %v229_v10 = vshrl.u32 %v222_v7, 7  ;;  %v999_v20 = vand.u32 127, %v222_v7  ;;  %s197_s12 = scalar_lea.vmem %s1281_s4, %s839_s9 }
   0xe   : > { %v920_v0 = vld [vmem:[%s192_s20] sm:$0xff]  ;;  %v815_v6 = vrot.slane %v206_v5, 9  ;;  %v814_v11 = vrot.slane %v975_v9, 9 }
   0xf   : > { %412 = vrot.lane.b32.xlu1 %v920_v0, %s871_s21  ;;  %385 = vrot.lane.b32.xlu0 %v920_v0, %s872_s22  ;;  %v928_v1 = vcombine.high %v920_v0, %v920_v0  ;;  %v982_v12 = vsub.s32 0, %v229_v10  ;;  %v984_v13 = vsub.s32 2, %v229_v10  ;;  %v316_v15 = vsub.s32 3, %v229_v10 }
  0x10   : > { %vm968_vm2 = vcmp.ne.s32.totalorder %v815_v6, 0  ;;  %vm987_vm4 = vcmp.ne.s32.totalorder %v814_v11, 0  ;;  %v993_v19 = vsub.s32 1, %v229_v10  ;;  %vm416_vm6 = vcmp.lt.s32.totalorder %v999_v20, 111 }
  0x11   : > { %vm212_vm3 = vmand %vm200_vm0, %vm968_vm2  ;;  %v344_v21 = vrot.slane %v206_v5, %v316_v15  ;;  %v395_v22 = vrot.slane %v206_v5, %v982_v12  ;;  %v399_v23 = vrot.slane %v206_v5, %v984_v13  ;;  %vm1283_vm10 = vcmp.lt.s32.totalorder %v999_v20, 127 }
  0x12   : > { %v419_v14 = vsel %vm212_vm3, 1, %v880_v4  ;;  %vm211_vm5 = vmand %vm200_vm0, %vm987_vm4  ;;  %v340_v28 = vrot.slane %v206_v5, %v993_v19  ;;  %vm389_vm12 = vcmp.lt.s32.totalorder %v999_v20, 112  ;;  %v313_v41 = vrot.slane %v975_v9, %v993_v19 }
  0x13   : > { %330 = vrot.lane.b32.xlu0 %v920_v0, %s873_s23  ;;  %414 = vrot.lane.b32.xlu1 %v928_v1, %s871_s21  ;;  %v427_v17 = vrot.slane %v419_v14, %v984_v13  ;;  %v423_v18 = vrot.slane %v419_v14, %v982_v12  ;;  %v364_v29 = vsel %vm211_vm5, 1, %v880_v4  ;;  %v352_v30 = vrot.slane %v344_v21, %v993_v19  ;;  %vm1033_vm11 = vmand %vm199_vm1, %vm968_vm2 }
  0x14   : > { %v1014_v31 = vrot.slane %v395_v22, %v982_v12  ;;  %v1017_v32 = vrot.slane %v399_v23, %v982_v12  ;;  %v368_v33 = vrot.slane %v364_v29, %v982_v12  ;;  %v372_v34 = vrot.slane %v364_v29, %v984_v13 }
  0x15   : > { %v1004_v24 = vrot.slane %v427_v17, %v982_v12  ;;  %v1007_v25 = vrot.slane %v423_v18, %v982_v12  ;;  %v1025_v37 = vrot.slane %v340_v28, %v993_v19  ;;  %vm1049_vm15 = vcmp.eq.s32.totalorder %v352_v30, 1 }
  0x16   : > { %vm1290_vm13 = vcmp.eq.s32.totalorder %v1014_v31, 1  ;;  %vm409_vm14 = vcmp.eq.s32.totalorder %v1017_v32, 1  ;;  %v1054_v45 = vrot.slane %v368_v33, %v982_v12  ;;  %v1057_v46 = vrot.slane %v372_v34, %v982_v12 }
  0x17   : > { %332 = vrot.lane.b32.xlu1 %v928_v1, %s873_s23  ;;  %387 = vrot.lane.b32.xlu0 %v928_v1, %s872_s22  ;;  %vm437_vm7 = vcmp.eq.s32.totalorder %v1004_v24, 1  ;;  %vm436_vm8 = vcmp.eq.s32.totalorder %v1007_v25, 1  ;;  %v317_v47 = vrot.slane %v975_v9, %v316_v15  ;;  %vm1282_vm0 = vcmp.eq.s32.totalorder %v1025_v37, 1 }
  0x18   : > { %vm1287_vm2 = vcmp.lt.s32.totalorder %v999_v20, 113  ;;  %v282_v50 = vsel %vm1033_vm11, 1, %v880_v4  ;;  %v1081_v58 = vrot.slane %v313_v41, %v993_v19  ;;  %vm1284_vm3 = vcmp.eq.s32.totalorder %v1054_v45, 1  ;;  %vm205_vm11 = vmand %vm199_vm1, %vm987_vm4 }
  0x19   : > { %vm1285_vm5 = vcmp.eq.s32.totalorder %v1057_v46, 1  ;;  %v325_v60 = vrot.slane %v317_v47, %v993_v19  ;;  %v258_v2 = vrot.slane %v975_v9, %v982_v12  ;;  %v262_v5 = vrot.slane %v975_v9, %v984_v13 }
  0x1a   : > { %v286_v6 = vrot.slane %v282_v50, %v982_v12  ;;  %v290_v17 = vrot.slane %v282_v50, %v984_v13  ;;  %v227_v3 = vsel %vm205_vm11, 1, %v880_v4  ;;  %vm1288_vm1 = vcmp.eq.s32.totalorder %v1081_v58, 1 }
  0x1b   : > { %359 = vrot.lane.b32.xlu1 %v928_v1, %s874_s24  ;;  %357 = vrot.lane.b32.xlu0 %v920_v0, %s874_s24  ;;  %v1114_v23 = vrot.slane %v258_v2, %v982_v12  ;;  %vm1119_vm4 = vcmp.eq.s32.totalorder %v325_v60, 1  ;;  %v231_v33 = vrot.slane %v227_v3, %v982_v12  ;;  %v235_v34 = vrot.slane %v227_v3, %v984_v13 }
  0x1c   : > { %v1126_v28 = vrot.slane %v286_v6, %v982_v12  ;;  %v1129_v29 = vrot.slane %v290_v17, %v982_v12  ;;  %vm1289_vm11 = vcmp.lt.s32.totalorder %v999_v20, 16 }
  0x1d   : > { %v1155_v41 = vrot.slane %v235_v34, %v982_v12 }
  0x1f   : > { %305 = vrot.lane.b32.xlu1 %v928_v1, %s875_s25  ;;  %303 = vrot.lane.b32.xlu0 %v920_v0, %s875_s25 }
  0x23   : > { %250 = vrot.lane.b32.xlu1 %v928_v1, %s877_s26  ;;  %248 = vrot.lane.b32.xlu0 %v920_v0, %s877_s26 }
  0x27   : > { %277 = vrot.lane.b32.xlu1 %v928_v1, %s878_s27  ;;  %275 = vrot.lane.b32.xlu0 %v920_v0, %s878_s27 }
  0x2b   : > { %220 = vrot.lane.b32.xlu1 %v928_v1, %s879_s28  ;;  %218 = vrot.lane.b32.xlu0 %v920_v0, %s879_s28 }
  0x81   : > { %v413_v26 = vpop.permute.xlu1 %412  ;;  %v386_v27 = vpop.permute.xlu0 %385 }
  0x85   : > { %v331_v35 = vpop.permute.xlu0 %330  ;;  %v415_v36 = vpop.permute.xlu1 %414 }
  0x86   : > { %v417_v38 = vsel %vm416_vm6, %v413_v26, %v415_v36  ;;  %v418_v40 = vsel %vm416_vm6, %v415_v36, %v413_v26  ;;  %v1117_v26 = vrot.slane %v262_v5, %v982_v12 }
  0x87   : > { %v439_v42 = vsel %vm437_vm7, %v418_v40, 0.0  ;;  %v438_v43 = vsel %vm436_vm8, %v417_v38, 0.0  ;;  %v1152_v40 = vrot.slane %v231_v33, %v982_v12 }
  0x88   : > { %816 = vmatprep.subr.msk.mxu0 %vm464_vm9, %v439_v42 }
  0x89   : > { %817 = vmatpush1.msk.msra.mxu0 %vm464_vm9, %v438_v43  ;;  %v333_v48 = vpop.permute.xlu1 %332  ;;  %v388_v49 = vpop.permute.xlu0 %387 }
  0x8a   : > { %v335_v51 = vsel %vm1283_vm10, %v331_v35, %v333_v48  ;;  %v336_v52 = vsel %vm1283_vm10, %v333_v48, %v331_v35  ;;  %v390_v53 = vsel %vm389_vm12, %v386_v27, %v388_v49  ;;  %v391_v54 = vsel %vm389_vm12, %v388_v49, %v386_v27 }
  0x8b   : > { %v356_v55 = vsel %vm1049_vm15, %v336_v52, 0.0  ;;  %v410_v56 = vsel %vm1290_vm13, %v390_v53, 0.0  ;;  %v411_v57 = vsel %vm409_vm14, %v391_v54, 0.0  ;;  %v355_v59 = vsel %vm1282_vm0, %v335_v51, 0.0 }
  0x8c   : > { %v455_v61 = vrot.slane %v356_v55, 4  ;;  %v460_v7 = vrot.slane %v410_v56, 4  ;;  %v461_v8 = vrot.slane %v411_v57, 4  ;;  %v454_v14 = vrot.slane %v355_v59, 4 }
  0x8d   : > { %v360_v62 = vpop.permute.xlu1 %359  ;;  %v358_v63 = vpop.permute.xlu0 %357  ;;  %vm1286_vm0 = vcmp.lt.s32.totalorder %v999_v20, 1  ;;  %vm1291_vm10 = vcmp.eq.s32.totalorder %v1114_v23, 1  ;;  %vm245_vm13 = vcmp.eq.s32.totalorder %v1155_v41, 1 }
  0x8e   : > { %v362_v10 = vsel %vm1287_vm2, %v358_v63, %v360_v62  ;;  %v363_v11 = vsel %vm1287_vm2, %v360_v62, %v358_v63  ;;  %v470_v22 = vsel %vm464_vm9, %v928_v1, %v455_v61  ;;  %v469_v4 = vsel %vm464_vm9, %v920_v0, %v454_v14 }
  0x8f   : > { %v383_v15 = vsel %vm1284_vm3, %v362_v10, 0.0  ;;  %v384_v9 = vsel %vm1285_vm5, %v363_v11, 0.0  ;;  %vm272_vm3 = vcmp.eq.s32.totalorder %v1117_v26, 1  ;;  %vm279_vm5 = vcmp.lt.s32.totalorder %v999_v20, 15 }
  0x90   : > { %v472_v18 = vsel %vm464_vm9, %v384_v9, %v461_v8  ;;  %v471_v19 = vsel %vm464_vm9, %v383_v15, %v460_v7  ;;  %vm300_vm2 = vcmp.eq.s32.totalorder %v1129_v29, 1  ;;  %v214_v7 = vld [vmem:[%s1279_s2] sm:$0xff] }
  0x91   : > { %v306_v21 = vpop.permute.xlu1 %305  ;;  %507 = vmatprep.subr.mxu0 %v472_v18  ;;  %v304_v16 = vpop.permute.xlu0 %303 }
  0x92   : > { %508 = vmatpush1.msra.mxu0 %v471_v19  ;;  %v308_v1 = vsel %vm1286_vm0, %v304_v16, %v306_v21  ;;  %v309_v30 = vsel %vm1286_vm0, %v306_v21, %v304_v16  ;;  %vm299_vm0 = vcmp.eq.s32.totalorder %v1126_v28, 1 }
  0x93   : > { %509 = vmatprep.subr.mxu0 %v470_v22  ;;  %v328_v36 = vsel %vm1288_vm1, %v309_v30, 0.0  ;;  %v329_v38 = vsel %vm1119_vm4, %v308_v1, 0.0  ;;  %vm224_vm1 = vcmp.lt.s32.totalorder %v999_v20, 17 }
  0x94   : > { %510 = vmatpush1.msra.mxu0 %v469_v4  ;;  %v448_v47 = vrot.slane %v328_v36, 4  ;;  %v449_v48 = vrot.slane %v329_v38, 4 }
  0x95   : > { %v251_v35 = vpop.permute.xlu1 %250  ;;  %v249_v0 = vpop.permute.xlu0 %248 }
  0x96   : > { %v253_v13 = vsel %vm1289_vm11, %v249_v0, %v251_v35  ;;  %v254_v39 = vsel %vm1289_vm11, %v251_v35, %v249_v0  ;;  %vm244_vm11 = vcmp.eq.s32.totalorder %v1152_v40, 1 }
  0x97   : > { %v273_v51 = vsel %vm1291_vm10, %v254_v39, 0.0  ;;  %v274_v52 = vsel %vm272_vm3, %v253_v13, 0.0  ;;  %vm473_vm10 = vcmask 293888  }
  0x98   : > { %v442_v59 = vrot.slane %v273_v51, 4  ;;  %v443_v60 = vrot.slane %v274_v52, 4 }
  0x99   : > { %v278_v42 = vpop.permute.xlu1 %277  ;;  %v276_v43 = vpop.permute.xlu0 %275 }
  0x9a   : > { %v280_v49 = vsel %vm279_vm5, %v276_v43, %v278_v42  ;;  %v281_v50 = vsel %vm279_vm5, %v278_v42, %v276_v43 }
  0x9b   : > { %v301_v12 = vsel %vm299_vm0, %v281_v50, 0.0  ;;  %v302_v53 = vsel %vm300_vm2, %v280_v49, 0.0 }
  0x9c   : > { %v468_v54 = vsel %vm464_vm9, %v302_v53, %v449_v48  ;;  %v467_v55 = vsel %vm464_vm9, %v301_v12, %v448_v47 }
  0x9d   : > { %v221_v56 = vpop.permute.xlu1 %220  ;;  %511 = vmatprep.subr.mxu0 %v468_v54  ;;  %v219_v57 = vpop.permute.xlu0 %218 }
  0x9e   : > { %v225_v61 = vsel %vm224_vm1, %v219_v57, %v221_v56  ;;  %v226_v62 = vsel %vm224_vm1, %v221_v56, %v219_v57  ;;  %512 = vmatpush1.msra.mxu0 %v467_v55 }
  0x9f   : > { %v246_v63 = vsel %vm244_vm11, %v226_v62, 0.0  ;;  %v247_v2 = vsel %vm245_vm13, %v225_v61, 0.0 }
  0xa0   : > { %v466_v5 = vsel %vm464_vm9, %v247_v2, %v443_v60  ;;  %v465_v6 = vsel %vm464_vm9, %v246_v63, %v442_v59 }
  0xa1   : > { %513 = vmatprep.subr.mxu0 %v466_v5 }
  0xa2   : > { %514 = vmatpush1.msra.mxu0 %v465_v6  ;;  %v581_v6 = vld [vmem:[%s1280_s3] sm:$0xff] }
  0xa3   : > { %818 = vmatmul.mubr.msk.f32.vlgmr.msra.gmra.mxu0 %vm473_vm10, %v214_v7 }
 0x163   : > { %v549_v8 = vpop.f32.mrf.mxu0 }
 0x164   : > { %v558_v15 = vmul.f32 %v549_v8, %v549_v8 }
 0x165   : > { %v551_v10 = vpop.f32.mrf.mxu0 }
 0x166   : > { %v559_v11 = vmul.f32 %v551_v10, %v551_v10  ;;  %v554_v14 = vadd.f32 %v551_v10, %v549_v8 }
 0x168   : > { %555 = vadd.xlane.f32.xlu0 %v554_v14  ;;  %v560_v9 = vadd.f32 %v559_v11, %v558_v15 }
 0x16a   : > { %561 = vadd.xlane.f32.xlu1 %v560_v9 }
 0x1f1   : > { %v556_v17 = vpop.xlane.xlu0 %555 }
 0x1f2   : > { %v557_v18 = vmul.f32 0.00390625, %v556_v17 }
 0x1f3   : > { %v562_v19 = vpop.xlane.xlu1 %561 }
 0x1f4   : > { %v564_v21 = vmul.f32 %v557_v18, %v557_v18  ;;  %v563_v16 = vmul.f32 0.00390625, %v562_v19  ;;  %v569_v1 = vsub.f32 0.0, %v557_v18 }
 0x1f6   : > { %v565_v3 = vsub.f32 %v563_v16, %v564_v21 }
 0x1f8   : > { %v566_v22 = vmax.f32 %v565_v3, 0.0 }
 0x1fa   : > { %v567_v4 = vadd.f32 1e-05, %v566_v22 }
 0x1fc   : > { %859 = vrsqrt.f32 %v567_v4 }
 0x209   : > { %v860_v30 = vpop.eup %859 }
 0x20a   : > { %v570_v33 = vmul.f32 %v860_v30, %v569_v1  ;;  %v572_v34 = vmul.f32 %v860_v30, %v551_v10  ;;  %v571_v35 = vmul.f32 %v860_v30, %v549_v8 }
 0x20c   : > { %v574_v0 = vadd.f32 %v572_v34, %v570_v33  ;;  %v573_v36 = vadd.f32 %v571_v35, %v570_v33 }
 0x20e   : > { %vm576_vm9 = vcmp.ge.f32.partialorder %v574_v0, 0.0  ;;  %v578_v38 = vmul.f32 0.1, %v574_v0  ;;  %vm575_vm10 = vcmp.ge.f32.partialorder %v573_v36, 0.0  ;;  %v577_v13 = vmul.f32 0.1, %v573_v36 }
 0x210   : > { %v580_v39 = vsel %vm576_vm9, %v574_v0, %v578_v38  ;;  %v579_v42 = vsel %vm575_vm10, %v573_v36, %v577_v13  ;;  %vm1302_vm9 = vcmp.eq.s32.totalorder %v1014_v31, 1  ;;  %vm1306_vm10 = vcmp.eq.s32.totalorder %v1054_v45, 1 }
 0x211   : > { %640 = vrot.lane.b32.xlu1 %v580_v39, %s871_s21  ;;  %638 = vrot.lane.b32.xlu0 %v579_v42, %s871_s21 }
 0x215   : > { %632 = vrot.lane.b32.xlu1 %v580_v39, %s872_s22  ;;  %630 = vrot.lane.b32.xlu0 %v579_v42, %s872_s22 }
 0x219   : > { %624 = vrot.lane.b32.xlu1 %v580_v39, %s874_s24  ;;  %622 = vrot.lane.b32.xlu0 %v579_v42, %s874_s24 }
 0x21d   : > { %616 = vrot.lane.b32.xlu1 %v580_v39, %s873_s23  ;;  %614 = vrot.lane.b32.xlu0 %v579_v42, %s873_s23 }
 0x221   : > { %608 = vrot.lane.b32.xlu1 %v580_v39, %s875_s25  ;;  %606 = vrot.lane.b32.xlu0 %v579_v42, %s875_s25 }
 0x225   : > { %600 = vrot.lane.b32.xlu1 %v580_v39, %s878_s27  ;;  %598 = vrot.lane.b32.xlu0 %v579_v42, %s878_s27 }
 0x229   : > { %592 = vrot.lane.b32.xlu1 %v580_v39, %s877_s26  ;;  %590 = vrot.lane.b32.xlu0 %v579_v42, %s877_s26 }
 0x22d   : > { %584 = vrot.lane.b32.xlu1 %v580_v39, %s879_s28  ;;  %582 = vrot.lane.b32.xlu0 %v579_v42, %s879_s28 }
 0x283   : > { %v641_v43 = vpop.permute.xlu1 %640  ;;  %v639_v47 = vpop.permute.xlu0 %638 }
 0x284   : > { %v643_v48 = vsel %vm416_vm6, %v641_v43, %v639_v47  ;;  %v642_v49 = vsel %vm416_vm6, %v639_v47, %v641_v43  ;;  %vm1303_vm6 = vcmp.lt.s32.totalorder %v999_v20, 113 }
 0x285   : > { %819 = vmatprep.subr.msk.mxu1 %vm437_vm7, %v643_v48  ;;  %vm1304_vm7 = vmmov %vm1303_vm6 }
 0x286   : > { %820 = vmatpush1.msk.msra.mxu1 %vm436_vm8, %v642_v49  ;;  %vm1305_vm8 = vcmp.eq.s32.totalorder %v1057_v46, 1 }
 0x287   : > { %v633_v50 = vpop.permute.xlu1 %632  ;;  %v631_v51 = vpop.permute.xlu0 %630 }
 0x288   : > { %v634_v52 = vsel %vm389_vm12, %v631_v51, %v633_v50  ;;  %v635_v12 = vsel %vm389_vm12, %v633_v50, %v631_v51  ;;  %vm1307_vm12 = vcmp.lt.s32.totalorder %v999_v20, 127 }
 0x289   : > { %821 = vmatprep.subr.msk.mxu1 %vm409_vm14, %v635_v12  ;;  %vm1308_vm14 = vmmov %vm1307_vm12 }
 0x28a   : > { %822 = vmatpush1.msk.msra.mxu1 %vm1302_vm9, %v634_v52  ;;  %vm1309_vm9 = vcmp.eq.s32.totalorder %v1025_v37, 1 }
 0x28b   : > { %v625_v53 = vpop.permute.xlu1 %624  ;;  %v623_v24 = vpop.permute.xlu0 %622 }
 0x28c   : > { %v626_v25 = vsel %vm1303_vm6, %v623_v24, %v625_v53  ;;  %v627_v54 = vsel %vm1304_vm7, %v625_v53, %v623_v24  ;;  %vm1310_vm6 = vcmp.lt.s32.totalorder %v999_v20, 1 }
 0x28d   : > { %823 = vmatprep.subr.msk.mxu1 %vm1305_vm8, %v627_v54  ;;  %vm1311_vm7 = vmmov %vm1310_vm6  ;;  %vm1312_vm8 = vcmp.eq.s32.totalorder %v1081_v58, 1 }
 0x28e   : > { %824 = vmatpush1.msk.msra.mxu1 %vm1306_vm10, %v626_v25  ;;  %vm1315_vm10 = vcmp.eq.s32.totalorder %v1114_v23, 1 }
 0x28f   : > { %v617_v55 = vpop.permute.xlu1 %616  ;;  %v615_v32 = vpop.permute.xlu0 %614 }
 0x290   : > { %v618_v31 = vsel %vm1307_vm12, %v615_v32, %v617_v55  ;;  %v619_v56 = vsel %vm1308_vm14, %v617_v55, %v615_v32 }
 0x291   : > { %825 = vmatprep.subr.msk.mxu1 %vm1049_vm15, %v619_v56  ;;  %vm1313_vm15 = vcmp.lt.s32.totalorder %v999_v20, 16 }
 0x292   : > { %826 = vmatpush1.msk.msra.mxu1 %vm1309_vm9, %v618_v31 }
 0x293   : > { %v609_v57 = vpop.permute.xlu1 %608  ;;  %672 = vmatprep.subr.mxu1 %v580_v39  ;;  %v607_v46 = vpop.permute.xlu0 %606 }
 0x294   : > { %v610_v45 = vsel %vm1310_vm6, %v607_v46, %v609_v57  ;;  %v611_v59 = vsel %vm1311_vm7, %v609_v57, %v607_v46  ;;  %673 = vmatpush1.msra.mxu1 %v579_v42 }
 0x295   : > { %827 = vmatprep.subr.msk.mxu1 %vm1119_vm4, %v610_v45  ;;  %vm1314_vm4 = vmmov %vm1313_vm15 }
 0x296   : > { %828 = vmatpush1.msk.msra.mxu1 %vm1312_vm8, %v611_v59 }
 0x297   : > { %v601_v44 = vpop.permute.xlu1 %600  ;;  %v599_v60 = vpop.permute.xlu0 %598 }
 0x298   : > { %v602_v37 = vsel %vm279_vm5, %v599_v60, %v601_v44  ;;  %v603_v61 = vsel %vm279_vm5, %v601_v44, %v599_v60 }
 0x299   : > { %829 = vmatprep.subr.msk.mxu1 %vm300_vm2, %v602_v37 }
 0x29a   : > { %830 = vmatpush1.msk.msra.mxu1 %vm299_vm0, %v603_v61  ;;  %vm646_vm0 = vcmask 588800  }
 0x29b   : > { %v593_v62 = vpop.permute.xlu1 %592  ;;  %v591_v27 = vpop.permute.xlu0 %590 }
 0x29c   : > { %v594_v58 = vsel %vm1313_vm15, %v591_v27, %v593_v62  ;;  %v595_v63 = vsel %vm1314_vm4, %v593_v62, %v591_v27 }
 0x29d   : > { %831 = vmatprep.subr.msk.mxu1 %vm272_vm3, %v594_v58 }
 0x29e   : > { %832 = vmatpush1.msk.msra.mxu1 %vm1315_vm10, %v595_v63 }
 0x29f   : > { %v585_v2 = vpop.permute.xlu1 %584  ;;  %v583_v29 = vpop.permute.xlu0 %582 }
 0x2a0   : > { %v586_v28 = vsel %vm224_vm1, %v583_v29, %v585_v2  ;;  %v587_v5 = vsel %vm224_vm1, %v585_v2, %v583_v29 }
 0x2a1   : > { %833 = vmatprep.subr.msk.mxu1 %vm245_vm13, %v586_v28 }
 0x2a2   : > { %834 = vmatpush1.msk.msra.mxu1 %vm244_vm11, %v587_v5 }
 0x2a3   : > { %835 = vmatmul.mubr.msk.f32.vlgmr.msra.gmra.mxu1 %vm646_vm0, %v581_v6 }
 0x363   : > { %v716_v23 = vpop.f32.mrf.mxu1 }
 0x364   : > { %v725_v10 = vmul.f32 %v716_v23, %v716_v23 }
 0x365   : > { %v718_v26 = vpop.f32.mrf.mxu1 }
 0x366   : > { %v726_v7 = vmul.f32 %v718_v26, %v718_v26  ;;  %v721_v8 = vadd.f32 %v718_v26, %v716_v23 }
 0x368   : > { %722 = vadd.xlane.f32.xlu0 %v721_v8  ;;  %v727_v20 = vadd.f32 %v726_v7, %v725_v10 }
 0x36a   : > { %728 = vadd.xlane.f32.xlu1 %v727_v20 }
 0x3f1   : > { %v723_v11 = vpop.xlane.xlu0 %722 }
 0x3f2   : > { %v724_v14 = vmul.f32 0.00390625, %v723_v11 }
 0x3f3   : > { %v729_v15 = vpop.xlane.xlu1 %728 }
 0x3f4   : > { %v731_v9 = vmul.f32 %v724_v14, %v724_v14  ;;  %v730_v17 = vmul.f32 0.00390625, %v729_v15  ;;  %v736_v40 = vsub.f32 0.0, %v724_v14 }
 0x3f6   : > { %v732_v41 = vsub.f32 %v730_v17, %v731_v9 }
 0x3f8   : > { %v733_v18 = vmax.f32 %v732_v41, 0.0 }
 0x3fa   : > { %v734_v19 = vadd.f32 1e-05, %v733_v18 }
 0x3fc   : > { %861 = vrsqrt.f32 %v734_v19 }
 0x409   : > { %v862_v21 = vpop.eup %861 }
 0x40a   : > { %v737_v16 = vmul.f32 %v862_v21, %v736_v40  ;;  %v738_v3 = vmul.f32 %v862_v21, %v716_v23  ;;  %v739_v22 = vmul.f32 %v862_v21, %v718_v26 }
 0x40c   : > { %v740_v4 = vadd.f32 %v738_v3, %v737_v16  ;;  %v741_v1 = vadd.f32 %v739_v22, %v737_v16 }
 0x40e   : > { %vm742_vm13 = vcmp.ge.f32.partialorder %v740_v4, 0.0  ;;  %vm743_vm2 = vcmp.ge.f32.partialorder %v741_v1, 0.0  ;;  %v744_v30 = vmul.f32 0.1, %v740_v4  ;;  %v745_v33 = vmul.f32 0.1, %v741_v1 }
 0x410   : > { %v746_v34 = vsel %vm742_vm13, %v740_v4, %v744_v30  ;;  %v747_v35 = vsel %vm743_vm2, %v741_v1, %v745_v33 }
 0x411   : > { %748 = vst [vmem:[%s197_s12] sm:$0xff] %v746_v34  ;;  %749 = vst [vmem:[%s197_s12 + $0x8] sm:$0xff] %v747_v35 }
 0x412 PF: > { %s14_s15 = sadd.s32 1, %s869_s15  }
 0x413   : > { %p11_p4 = scmp.ge.s32.totalorder %s14_s15, 4  }
 0x415   :  { %13 = sbr.rel (!%p11_p4) target bundleno = 1 (0x1), region = 66 }

</bundles_post_ra>
